<compile_context>
chip_gen: v5e
topology: v5e:2x2
jax: 0.10.0
libtpu: 0.0.40
codegen_flags: <defaults>
</compile_context>

<pallas_src>
import functools

import jax
import jax.numpy as jnp
from jax.experimental import pallas as pl
from jax.experimental.pallas import tpu as pltpu

IGNORE_INDEX = -100
SMOOTH = 1.0


def _dice_kernel(diff_ref, y_ref, loss_ref):
    # diff_ref : [T, S] f32  (logit_class1 - logit_class0)
    # y_ref    : [T, S] i32  labels (may contain IGNORE_INDEX)
    # loss_ref : [T, 1] f32  per-sample dice loss
    y = y_ref[...]
    valid = y != IGNORE_INDEX
    validf = valid.astype(jnp.float32)

    # softmax over 2 classes == sigmoid of the logit difference; multiplying by
    # the mask reproduces `probs.mul(mask)` exactly (ignored positions -> 0).
    p1 = validf * jax.nn.sigmoid(diff_ref[...])

    # one-hot class-1 target after ignored labels were forced to class 0.
    t1 = jnp.where(valid & (y == 1), 1.0, 0.0)

    pn = p1 * (1.0 - p1)                                    # (1 - p1) * p1
    num = 2.0 * jnp.sum(pn * t1, axis=1, keepdims=True) + SMOOTH
    den = (jnp.sum(pn * pn, axis=1, keepdims=True)          # p1^2 (1-p1)^2
           + jnp.sum(t1, axis=1, keepdims=True)             # t1^2 == t1
           + SMOOTH)
    # Per-row divide: O(T) per block, negligible; the per-element divide of the
    # softmax denominator was removed entirely by the sigmoid formulation.
    loss_ref[...] = 1.0 - num / den


def _choose_tile_n(n, s):
    """Rows per block: ~2 MiB of f32 per input per step, multiple of 8."""
    if n <= 8:
        return n                      # block == full batch dim (always legal)
    rows = max(8, (512 * 1024) // max(s, 1))
    rows = min(rows, n)
    return max(8, (rows // 8) * 8)    # (8, 128) rule on the second-minor dim


@functools.partial(jax.jit, static_argnames=())
def dice_loss(output, y):
    """output: [N, S, 2] float logits; y: [N, S, 1] int labels -> scalar mean loss."""
    n, s, c = output.shape
    assert c == 2 and y.shape == (n, s, 1)

    # One fused elementwise op (half-sized result) replaces the old two
    # full-size strided class copies.
    diff = (output[..., 1] - output[..., 0]).astype(jnp.float32)   # [N, S]
    labels = y.reshape(n, s).astype(jnp.int32)                     # free view

    tile_n = _choose_tile_n(n, s)
    grid = (pl.cdiv(n, tile_n),)

    per_row = pl.pallas_call(
        _dice_kernel,
        out_shape=jax.ShapeDtypeStruct((n, 1), jnp.float32),
        grid_spec=pltpu.PrefetchScalarGridSpec(
            num_scalar_prefetch=0,
            grid=grid,
            in_specs=[
                pl.BlockSpec((tile_n, s), lambda i: (i, 0)),
                pl.BlockSpec((tile_n, s), lambda i: (i, 0)),
            ],
            out_specs=pl.BlockSpec((tile_n, 1), lambda i: (i, 0)),
        ),
        compiler_params=pltpu.CompilerParams(
            dimension_semantics=("parallel",),          # shard tiles across TCs (v7x)
            vmem_limit_bytes=32 * 1024 * 1024,          # portable headroom (<= v7x scoped)
        ),
        cost_estimate=pl.CostEstimate(                  # memory-bound hint for XLA
            flops=10 * n * s,
            transcendentals=n * s,
            bytes_accessed=8 * n * s + 4 * n,
        ),
    )(diff, labels)

    # reduction='mean' over the N per-sample losses (tiny; done in XLA).
    return jnp.mean(per_row)


def _dice_ref(output, y):
    """Pure-JAX reference mirroring the PyTorch DiceLoss.forward exactly."""
    mask = (y != IGNORE_INDEX)                                   # [N, S, 1]
    yc = y * mask.astype(y.dtype)
    out = output * mask.astype(output.dtype)                     # [N, S, 2]
    target = jax.nn.one_hot(yc[..., 0], 2, dtype=jnp.float32)    # [N, S, 2]
    t1 = target[:, :, -1][..., None]                             # [N, S, 1]
    probs = jax.nn.softmax(out, axis=-1) * mask.astype(output.dtype)
    p1 = probs[:, :, -1][..., None]                              # [N, S, 1]
    negp = 1.0 - p1
    num = 2.0 * jnp.sum(negp * p1 * t1, axis=1) + SMOOTH         # [N, 1]
    den = (jnp.sum((p1 ** 2) * (negp ** 2), axis=1)
           + jnp.sum(t1 ** 2, axis=1) + SMOOTH)                  # [N, 1]
    loss = 1.0 - num / den
    return jnp.mean(loss)


if __name__ == "__main__":
    key = jax.random.PRNGKey(0)
    k1, k2 = jax.random.split(key)

    N, S = 2, 16
    logits = jax.random.normal(k1, (N, S, 2), dtype=jnp.float32)
    labels = jax.random.randint(k2, (N, S, 1), 0, 2, dtype=jnp.int32)
    # mark a few positions as ignored, deterministically
    labels = labels.at[:, :3, :].set(IGNORE_INDEX)

    loss = jax.block_until_ready(dice_loss(logits, labels))
    ref = jax.block_until_ready(_dice_ref(logits, labels))

    assert jnp.isfinite(loss), "kernel produced non-finite loss"
    assert jnp.allclose(loss, ref, rtol=1e-5, atol=1e-5), (loss, ref)
    print("KERNEL_OK")
</pallas_src>

<mosaic_0001>
module attributes {stable_mosaic.version = 11 : i64} {
  func.func @_dice_kernel(%arg0: i32, %arg1: memref<2x16xf32, #tpu.memory_space<vmem>>, %arg2: memref<2x16xi32, #tpu.memory_space<vmem>>, %arg3: memref<2x1xf32, #tpu.memory_space<vmem>>) attributes {dimension_semantics = [#tpu.dimension_semantics<parallel>], iteration_bounds = array<i64: 1>, scalar_prefetch = 0 : i64, scratch_operands = 0 : i64, tpu.core_type = #tpu.core_type<tc>, window_params = [{transform_indices = @transform_0, window_bounds = array<i64: 2, 16>}, {transform_indices = @transform_1, window_bounds = array<i64: 2, 16>}, {transform_indices = @transform_2, window_bounds = array<i64: 2, 1>}]} {
    %c0 = arith.constant 0 : index
    %c0_0 = arith.constant 0 : index
    %0 = vector.load %arg2[%c0, %c0_0] : memref<2x16xi32, #tpu.memory_space<vmem>>, vector<2x16xi32>
    %c-100_i32 = arith.constant -100 : i32
    %1 = vector.broadcast %c-100_i32 : i32 to vector<2x16xi32>
    %2 = arith.cmpi ne, %0, %1 : vector<2x16xi32>
    %3 = arith.extui %2 : vector<2x16xi1> to vector<2x16xi32>
    %4 = arith.sitofp %3 : vector<2x16xi32> to vector<2x16xf32>
    %c0_1 = arith.constant 0 : index
    %c0_2 = arith.constant 0 : index
    %5 = vector.load %arg1[%c0_1, %c0_2] : memref<2x16xf32, #tpu.memory_space<vmem>>, vector<2x16xf32>
    %6 = arith.negf %5 : vector<2x16xf32>
    %7 = math.exp %6 : vector<2x16xf32>
    %cst = arith.constant 1.000000e+00 : f32
    %8 = vector.broadcast %cst : f32 to vector<2x16xf32>
    %9 = arith.addf %8, %7 : vector<2x16xf32>
    %10 = arith.divf %8, %9 : vector<2x16xf32>
    %11 = arith.mulf %4, %10 : vector<2x16xf32>
    %c1_i32 = arith.constant 1 : i32
    %12 = vector.broadcast %c1_i32 : i32 to vector<2x16xi32>
    %13 = arith.cmpi eq, %0, %12 : vector<2x16xi32>
    %14 = arith.andi %2, %13 : vector<2x16xi1>
    %cst_3 = arith.constant 1.000000e+00 : f32
    %cst_4 = arith.constant 0.000000e+00 : f32
    %15 = vector.broadcast %cst_3 : f32 to vector<2x16xf32>
    %16 = vector.broadcast %cst_4 : f32 to vector<2x16xf32>
    %17 = arith.select %14, %15, %16 : vector<2x16xi1>, vector<2x16xf32>
    %cst_5 = arith.constant 1.000000e+00 : f32
    %18 = vector.broadcast %cst_5 : f32 to vector<2x16xf32>
    %19 = arith.subf %18, %11 : vector<2x16xf32>
    %20 = arith.mulf %11, %19 : vector<2x16xf32>
    %21 = arith.mulf %20, %17 : vector<2x16xf32>
    %cst_6 = arith.constant dense<0.000000e+00> : vector<2xf32>
    %22 = vector.multi_reduction <add>, %21, %cst_6 [1] : vector<2x16xf32> to vector<2xf32>
    %23 = vector.shape_cast %22 : vector<2xf32> to vector<2x1xf32>
    %cst_7 = arith.constant 2.000000e+00 : f32
    %24 = vector.broadcast %cst_7 : f32 to vector<2x1xf32>
    %25 = arith.mulf %24, %23 : vector<2x1xf32>
    %cst_8 = arith.constant 1.000000e+00 : f32
    %26 = vector.broadcast %cst_8 : f32 to vector<2x1xf32>
    %27 = arith.addf %25, %26 : vector<2x1xf32>
    %28 = arith.mulf %20, %20 : vector<2x16xf32>
    %cst_9 = arith.constant dense<0.000000e+00> : vector<2xf32>
    %29 = vector.multi_reduction <add>, %28, %cst_9 [1] : vector<2x16xf32> to vector<2xf32>
    %30 = vector.shape_cast %29 : vector<2xf32> to vector<2x1xf32>
    %cst_10 = arith.constant dense<0.000000e+00> : vector<2xf32>
    %31 = vector.multi_reduction <add>, %17, %cst_10 [1] : vector<2x16xf32> to vector<2xf32>
    %32 = vector.shape_cast %31 : vector<2xf32> to vector<2x1xf32>
    %33 = arith.addf %30, %32 : vector<2x1xf32>
    %cst_11 = arith.constant 1.000000e+00 : f32
    %34 = vector.broadcast %cst_11 : f32 to vector<2x1xf32>
    %35 = arith.addf %33, %34 : vector<2x1xf32>
    %36 = arith.divf %27, %35 : vector<2x1xf32>
    %cst_12 = arith.constant 1.000000e+00 : f32
    %37 = vector.broadcast %cst_12 : f32 to vector<2x1xf32>
    %38 = arith.subf %37, %36 : vector<2x1xf32>
    %c0_13 = arith.constant 0 : index
    %c0_14 = arith.constant 0 : index
    %39 = vector.load %arg3[%c0_13, %c0_14] : memref<2x1xf32, #tpu.memory_space<vmem>>, vector<2x1xf32>
    tpu.vector_store %arg3[%c0_13, %c0_14], %38 {strides = array<i32>} : memref<2x1xf32, #tpu.memory_space<vmem>>, vector<2x1xf32>,
    return
  }
  func.func @transform_0(%arg0: i32) -> (i32, i32) {
    %c0_i32 = arith.constant 0 : i32
    %c0_i32_0 = arith.constant 0 : i32
    return %arg0, %c0_i32 : i32, i32
  }
  func.func @transform_1(%arg0: i32) -> (i32, i32) {
    %c0_i32 = arith.constant 0 : i32
    %c0_i32_0 = arith.constant 0 : i32
    return %arg0, %c0_i32 : i32, i32
  }
  func.func @transform_2(%arg0: i32) -> (i32, i32) {
    %c0_i32 = arith.constant 0 : i32
    %c0_i32_0 = arith.constant 0 : i32
    return %arg0, %c0_i32 : i32, i32
  }
}

</mosaic_0001>

<bundles_post_ra>
// kernel: dice_loss.1
= control target key start
LH: loop header
LB: loop body
LE: loop exit
PB: predicated region body
PF: predicated region fallthrough
CT: control target
= control target key end

     0   :  { %v88_v13 = vmov 0.0   ;;  %vm42_vm7 = vcmask 123904   ;;  %vm73_vm12 = vcmask 1024   ;;  %s113_s0 = inlined_call_operand.vmem [shape: f32[2,16], index: 0, kind: input, shape index: {}]   ;;  %s114_s1 = inlined_call_operand.vmem [shape: s32[2,16], index: 1, kind: input, shape index: {}]   ;;  %s115_s2 = inlined_call_operand.vmem [shape: f32[2,1], index: 2, kind: output, shape index: {}]  }
   0x1   :  { %v15_v0 = vld [vmem:[%s113_s0] sm:$0x3] }
   0x2   :  { %v80_v1 = vmul.f32 -1.442695, %v15_v0  ;;  %v11_v6 = vld [vmem:[%s114_s1] sm:$0x3] }
   0x3   :  { %vm12_vm2 = vcmp.ne.s32.totalorder %v11_v6, 4294967196  ;;  %vm36_vm5 = vcmp.eq.s32.totalorder %v11_v6, 1 }
   0x4   :  { %82 = vpow2.f32 %v80_v1  ;;  %v79_v14 = vsel %vm12_vm2, 1.0, %v88_v13  ;;  %vm37_vm6 = vmand %vm12_vm2, %vm36_vm5 }
   0x5   :  { %v38_v20 = vsel %vm37_vm6, 1.0, %v88_v13 }
   0x6   :  { %v52_v25 = vsel %vm42_vm7, %v38_v20, 0.0 }
   0xa   :  { %v83_v2 = vpop.eup %82 }
   0xb   :  { %v19_v3 = vadd.f32 1.0, %v83_v2 }
   0xd   :  { %84 = vrcp.f32 %v19_v3  ;;  %v31_v7 = vand.u32 2147483648, %v19_v3  ;;  %vm25_vm0 = vweird.f32 %v19_v3  ;;  %v29_v9 = vand.u32 2147483647, %v19_v3 }
   0xf   :  { %v32_v11 = vor.u32 1.1754944e-38, %v31_v7  ;;  %vm30_vm4 = vcmp.eq.f32.partialorder %v29_v9, 8.507059e+37 }
  0x13   :  { %v85_v4 = vpop.eup %84 }
  0x14   :  { %v21_v5 = vmul.f32 %v85_v4, %v19_v3  ;;  %vm26_vm1 = vweird.f32 %v85_v4 }
  0x15   :  { %vm27_vm3 = vmor %vm25_vm0, %vm26_vm1 }
  0x16   :  { %v22_v8 = vsub.f32 1.0, %v21_v5 }
  0x18   :  { %v23_v10 = vmul.f32 %v85_v4, %v22_v8 }
  0x1a   :  { %v24_v12 = vadd.f32 %v85_v4, %v23_v10 }
  0x1c   :  { %v28_v15 = vsel %vm27_vm3, %v85_v4, %v24_v12 }
  0x1d   :  { %v33_v16 = vsel %vm30_vm4, %v32_v11, %v28_v15 }
  0x1e   :  { %v35_v17 = vmul.f32 %v79_v14, %v33_v16 }
  0x20   :  { %v39_v18 = vsub.f32 1.0, %v35_v17 }
  0x22   :  { %v40_v19 = vmul.f32 %v39_v18, %v35_v17 }
  0x24   :  { %v48_v21 = vmul.f32 %v40_v19, %v40_v19  ;;  %v41_v22 = vmul.f32 %v40_v19, %v38_v20 }
  0x26   :  { %v49_v23 = vsel %vm42_vm7, %v48_v21, 0.0  ;;  %v43_v24 = vsel %vm42_vm7, %v41_v22, 0.0 }
  0x27   :  { %50 = vadd.xlane.f32.xlu0 %v49_v23  ;;  %44 = vadd.xlane.f32.xlu1 %v43_v24 }
  0x2f   :  { %53 = vadd.xlane.f32.xlu0 %v52_v25 }
  0x9a   :  { %v51_v26 = vpop.xlane.xlu0 %50  ;;  %v45_v31 = vpop.xlane.xlu1 %44 }
  0x9b   :  { %v46_v34 = vmul.f32 2.0, %v45_v31 }
  0x9d   :  { %v47_v39 = vadd.f32 1.0, %v46_v34 }
  0xa2   :  { %v54_v27 = vpop.xlane.xlu0 %53 }
  0xa3   :  { %v55_v28 = vadd.f32 %v54_v27, %v51_v26 }
  0xa5   :  { %v56_v29 = vadd.f32 1.0, %v55_v28 }
  0xa7   :  { %86 = vrcp.f32 %v56_v29  ;;  %v68_v35 = vand.u32 2147483648, %v56_v29  ;;  %v66_v37 = vand.u32 2147483647, %v56_v29  ;;  %vm62_vm9 = vweird.f32 %v56_v29 }
  0xa9   :  { %v69_v40 = vor.u32 1.1754944e-38, %v68_v35  ;;  %vm67_vm11 = vcmp.eq.f32.partialorder %v66_v37, 8.507059e+37 }
  0xad   :  { %v87_v30 = vpop.eup %86 }
  0xae   :  { %v58_v32 = vmul.f32 %v87_v30, %v56_v29  ;;  %vm63_vm8 = vweird.f32 %v87_v30 }
  0xaf   :  { %vm64_vm10 = vmor %vm62_vm9, %vm63_vm8 }
  0xb0   :  { %v59_v33 = vsub.f32 1.0, %v58_v32 }
  0xb2   :  { %v60_v36 = vmul.f32 %v87_v30, %v59_v33 }
  0xb4   :  { %v61_v38 = vadd.f32 %v87_v30, %v60_v36 }
  0xb6   :  { %v65_v41 = vsel %vm64_vm10, %v87_v30, %v61_v38 }
  0xb7   :  { %v70_v42 = vsel %vm67_vm11, %v69_v40, %v65_v41 }
  0xb8   :  { %v71_v43 = vmul.f32 %v70_v42, %v47_v39 }
  0xba   :  { %v72_v44 = vsub.f32 1.0, %v71_v43 }
  0xbc   :  { %74 = vst.msk [vmem:[%s115_s2] sm:$0x3] %vm73_vm12, %v72_v44 }

</bundles_post_ra>
